<compile_context>
chip_gen: v7x
topology: tpu7x:2x2x1
jax: 0.10.0
libtpu: 0.0.40
codegen_flags: <defaults>
</compile_context>

<pallas_src>
import jax
import jax.numpy as jnp
from jax import lax
from jax.experimental import pallas as pl
from jax.experimental.pallas import tpu as pltpu


def _linear_sigmoid_kernel(x_ref, w_ref, b_ref, o_ref):
    # x_ref: [TB, D]  (VMEM) -- batch tile
    # w_ref: [C, D]   (VMEM) -- PyTorch nn.Linear layout, resident across steps
    # b_ref: [C, 1]   (VMEM) -- resident across steps
    # o_ref: [C, TB]  (VMEM) -- lane-dense output tile
    # MXU matmul with f32 accumulation: LHS = w [C, D] (already [M, K]),
    # RHS contraction on dim 1 of x -> output [C, TB].
    logits = lax.dot_general(
        w_ref[...], x_ref[...],
        dimension_numbers=(((1,), (1,)), ((), ())),
        preferred_element_type=jnp.float32,
    )
    logits = logits + b_ref[...]                 # (C, 1) broadcast over lanes
    o_ref[...] = jax.nn.sigmoid(logits).astype(o_ref.dtype)  # EUP exp + VPU


def _round_up(a, m):
    return ((a + m - 1) // m) * m


def cancer_classification_forward(x, weight, bias, *, max_block_b=8192,
                                   single_block_b=1024):
    """x: [B, D] f32, weight: [C, D] f32 (PyTorch nn.Linear layout), bias: [C] f32.

    Returns sigmoid(x @ weight.T + bias) with shape [B, C].
    """
    B, D = x.shape
    C, D_w = weight.shape
    assert D == D_w, (D, D_w)
    assert bias.shape == (C,), bias.shape

    # Batch tile selection:
    #  * tiny/small B: one full-extent block (always layout-legal, any B).
    #  * larger B: at least 2 grid steps (so v7x megacore can shard the
    #    "parallel" axis), tiles are multiples of 128 (legal lane dim for the
    #    [C, tb] output block and sublane-legal for the [tb, D] input block),
    #    capped at max_block_b (4 MiB padded x block -> fits every generation's
    #    scoped VMEM with double buffering to spare).
    if B <= single_block_b:
        tb = B
    else:
        tb = min(max_block_b, _round_up(pl.cdiv(B, 2), 128))
    grid = (pl.cdiv(B, tb),)

    bias2d = bias.reshape(C, 1)

    # Honest tiny cost estimate: 2*B*D*C MACs, B*C sigmoids, f32 I/O bytes.
    cost = pl.CostEstimate(
        flops=2 * B * D * C,
        transcendentals=B * C,
        bytes_accessed=4 * (B * D + C * D + C + B * C),
    )

    out_cb = pl.pallas_call(
        _linear_sigmoid_kernel,
        out_shape=jax.ShapeDtypeStruct((C, B), jnp.float32),
        grid=grid,
        in_specs=[
            # x: tiled over the batch grid axis.
            pl.BlockSpec((tb, D), lambda i: (i, 0), memory_space=pltpu.VMEM),
            # weight / bias: full blocks, resident across all grid steps.
            pl.BlockSpec((C, D), lambda i: (0, 0), memory_space=pltpu.VMEM),
            pl.BlockSpec((C, 1), lambda i: (0, 0), memory_space=pltpu.VMEM),
        ],
        # Lane-dense output: batch tile on the lane (last) axis.
        out_specs=pl.BlockSpec((C, tb), lambda i: (0, i),
                               memory_space=pltpu.VMEM),
        compiler_params=pltpu.CompilerParams(
            dimension_semantics=("parallel",),
        ),
        cost_estimate=cost,
    )(x, weight, bias2d)

    # One-time layout plumbing back to the PyTorch [B, C] convention.
    return out_cb.T


if __name__ == "__main__":
    # Small shapes consistent with the module: batch=8, input_size=32, num_classes=4.
    B, INPUT_SIZE, NUM_CLASSES = 8, 32, 4

    key = jax.random.PRNGKey(0)
    kx, kw, kb = jax.random.split(key, 3)

    # Deterministic parameter init mimicking nn.Linear default:
    # U(-1/sqrt(in_features), 1/sqrt(in_features)).
    bound = 1.0 / (INPUT_SIZE ** 0.5)
    weight = jax.random.uniform(kw, (NUM_CLASSES, INPUT_SIZE),
                                minval=-bound, maxval=bound, dtype=jnp.float32)
    bias = jax.random.uniform(kb, (NUM_CLASSES,),
                              minval=-bound, maxval=bound, dtype=jnp.float32)
    x = jax.random.normal(kx, (B, INPUT_SIZE), dtype=jnp.float32)

    out = cancer_classification_forward(x, weight, bias)
    out = jax.block_until_ready(out)

    # Reference check (pure JAX) to make sure the kernel matches semantics.
    ref = jax.nn.sigmoid(x @ weight.T + bias)
    assert out.shape == (B, NUM_CLASSES)
    assert jnp.allclose(out, ref, atol=1e-5, rtol=1e-5)

    # Also exercise a larger, non-tile-aligned batch to check the multi-step
    # (>= 2 grid steps, partial last tile) path.
    B2 = 3000
    x2 = jax.random.normal(jax.random.PRNGKey(1), (B2, INPUT_SIZE),
                           dtype=jnp.float32)
    out2 = jax.block_until_ready(cancer_classification_forward(x2, weight, bias))
    ref2 = jax.nn.sigmoid(x2 @ weight.T + bias)
    assert out2.shape == (B2, NUM_CLASSES)
    assert jnp.allclose(out2, ref2, atol=1e-5, rtol=1e-5)

    print("KERNEL_OK")
</pallas_src>

<mosaic_0001>
module attributes {stable_mosaic.version = 11 : i64} {
  func.func @_linear_sigmoid_kernel(%arg0: i32, %arg1: memref<8x32xf32, #tpu.memory_space<vmem>>, %arg2: memref<4x32xf32, #tpu.memory_space<vmem>>, %arg3: memref<4x1xf32, #tpu.memory_space<vmem>>, %arg4: memref<4x8xf32, #tpu.memory_space<vmem>>) attributes {dimension_semantics = [#tpu.dimension_semantics<parallel>], iteration_bounds = array<i64: 1>, scalar_prefetch = 0 : i64, scratch_operands = 0 : i64, tpu.core_type = #tpu.core_type<tc>, window_params = [{transform_indices = @transform_0, window_bounds = array<i64: 8, 32>}, {pipeline_mode = #tpu.pipeline_mode<synchronous>, transform_indices = @transform_1, window_bounds = array<i64: 4, 32>}, {pipeline_mode = #tpu.pipeline_mode<synchronous>, transform_indices = @transform_2, window_bounds = array<i64: 4, 1>}, {transform_indices = @transform_3, window_bounds = array<i64: 4, 8>}]} {
    %c0 = arith.constant 0 : index
    %c0_0 = arith.constant 0 : index
    %0 = vector.load %arg2[%c0, %c0_0] : memref<4x32xf32, #tpu.memory_space<vmem>>, vector<4x32xf32>
    %c0_1 = arith.constant 0 : index
    %c0_2 = arith.constant 0 : index
    %1 = vector.load %arg1[%c0_1, %c0_2] : memref<8x32xf32, #tpu.memory_space<vmem>>, vector<8x32xf32>
    %cst = arith.constant dense<0.000000e+00> : vector<4x8xf32>
    %2 = tpu.matmul %0, %1, %cst {dimension_numbers = #tpu.dot_dimension_numbers<[1], [1], [0], [0], [0, 0, 1, 0], [], []>} : vector<4x32xf32>, vector<8x32xf32>, vector<4x8xf32> -> vector<4x8xf32>
    %c0_3 = arith.constant 0 : index
    %c0_4 = arith.constant 0 : index
    %3 = vector.load %arg3[%c0_3, %c0_4] : memref<4x1xf32, #tpu.memory_space<vmem>>, vector<4x1xf32>
    %4 = vector.broadcast %3 : vector<4x1xf32> to vector<4x8xf32>
    %5 = arith.addf %2, %4 : vector<4x8xf32>
    %6 = arith.negf %5 : vector<4x8xf32>
    %7 = math.exp %6 : vector<4x8xf32>
    %cst_5 = arith.constant 1.000000e+00 : f32
    %8 = vector.broadcast %cst_5 : f32 to vector<4x8xf32>
    %9 = arith.addf %8, %7 : vector<4x8xf32>
    %10 = arith.divf %8, %9 : vector<4x8xf32>
    %c0_6 = arith.constant 0 : index
    %c0_7 = arith.constant 0 : index
    %11 = vector.load %arg4[%c0_6, %c0_7] : memref<4x8xf32, #tpu.memory_space<vmem>>, vector<4x8xf32>
    tpu.vector_store %arg4[%c0_6, %c0_7], %10 {strides = array<i32>} : memref<4x8xf32, #tpu.memory_space<vmem>>, vector<4x8xf32>,
    return
  }
  func.func @transform_0(%arg0: i32) -> (i32, i32) {
    %c0_i32 = arith.constant 0 : i32
    %c0_i32_0 = arith.constant 0 : i32
    return %arg0, %c0_i32 : i32, i32
  }
  func.func @transform_1(%arg0: i32) -> (i32, i32) {
    %c0_i32 = arith.constant 0 : i32
    %c0_i32_0 = arith.constant 0 : i32
    %c0_i32_1 = arith.constant 0 : i32
    return %c0_i32, %c0_i32_0 : i32, i32
  }
  func.func @transform_2(%arg0: i32) -> (i32, i32) {
    %c0_i32 = arith.constant 0 : i32
    %c0_i32_0 = arith.constant 0 : i32
    %c0_i32_1 = arith.constant 0 : i32
    return %c0_i32, %c0_i32_0 : i32, i32
  }
  func.func @transform_3(%arg0: i32) -> (i32, i32) {
    %c0_i32 = arith.constant 0 : i32
    %c0_i32_0 = arith.constant 0 : i32
    return %c0_i32, %arg0 : i32, i32
  }
}

</mosaic_0001>

<bundles_post_ra>
// kernel: tpu_custom_call.1
= control target key start
LH: loop header
LB: loop body
LE: loop exit
PB: predicated region body
PF: predicated region fallthrough
CT: control target
= control target key end

     0   :  { %8 = vsyncpa [#allocation3], 0  ;;  %s258_s0 = inlined_call_operand.hbm [shape: f32[8,32], index: 0, kind: input, shape index: {}]   ;;  %s259_s1 = inlined_call_operand.vmem [shape: f32[4,32], index: 1, kind: input, shape index: {}]   ;;  %s260_s2 = inlined_call_operand.vmem [shape: f32[4,1], index: 2, kind: input, shape index: {}]   ;;  %s261_s3 = inlined_call_operand.hbm [shape: f32[4,8], index: 3, kind: output, shape index: {}]  }
   0x1   :  { %9 = vsyncpa [#allocation4], 0  ;;  %s203_s12 = smov [#allocation2]   ;;  %s155_s16 = scalar_lea.hbm %s258_s0, 128 }
   0x2   :  { %s16_s13 = sshll.u32 %s203_s12, 4  ;;  %p156_p0 = scmp.ne.s32.totalorder %s258_s0, %s155_s16  ;;  %s17_s13 = int_to_ptr.vmem [resolvable:$true] %s16_s13 }
   0x3   :  { %p159_p1 = scmp.lt.u32.totalorder %s155_s16, %s258_s0 }
   0x5   :  { %p161_p2 = pnand %p159_p1, %p156_p0 }
   0x7   :  { %164 = shalt.err (!%p161_p2)
}
   0x8   :  { %s165_s21 = scalar_lea.vmem %s17_s13, 128  ;;  %p170_p4 = scmp.lt.s32.totalorder %s17_s13, %s17_s13 }
   0x9   :  { %p166_p3 = scmp.ne.s32.totalorder %s17_s13, %s165_s21  ;;  %p171_p5 = scmp.lt.s32.totalorder %s165_s21, %s165_s21 }
   0xb   :  { %p172_p6 = por %p171_p5, %p170_p4 }
   0xd   :  { %p173_p7 = pnand %p172_p6, %p166_p3 }
   0xf   :  { %176 = shalt.err (!%p173_p7)
}
  0x10   :  { %19 = dma.hbm_to_vmem [thread:$0]  %s258_s0, 128, %s17_s13, [#allocation3]  }
  0x11   :  { %199 = dma.done.wait [#allocation3], 128  }
  0x12   :  { %200 = vsyncadd [#allocation3], 4294967168  ;;  %v204_v0 = vmov 0.0   ;;  %vm205_vm0 = vmmov 0   ;;  %v206_v1 = vmov 0   ;;  %vm35_vm1 = vcmask 261120  }
  0x13   :  { %140 = vmatprep.subr.mxu0 %v204_v0  ;;  %142 = vmatprep.mubr.msk.f32.mxu0 %vm205_vm0, %v204_v0  ;;  %v28_v2 = vld [vmem:[#allocation2] sm:$0xff]  ;;  %s207_s0 = smov [#allocation5]   ;;  %vm118_vm2 = vcmask 60416  }
  0x14   :  { %150 = vset.pattern.permute.xlu0 %v206_v1  ;;  %v29_v3 = vld [vmem:[%s260_s2] sm:$0xf]  ;;  %141 = vmatpush3.xpose.msk.msra.mxu0 %vm35_vm1, %v28_v2  ;;  %s126_s28 = sshll.u32 %s207_s0, 4  ;;  %s127_s28 = int_to_ptr.vmem [resolvable:$true] %s126_s28 }
  0x15   :  { %v27_v4 = vld [vmem:[%s259_s1] sm:$0xf]  ;;  %32 = vperm.xlu0 %150, %v29_v3   ;;  %s177_s2 = scalar_lea.vmem %s127_s28, 64  ;;  %p182_p9 = scmp.lt.s32.totalorder %s127_s28, %s127_s28 }
  0x16   :  { %p178_p8 = scmp.ne.s32.totalorder %s127_s28, %s177_s2  ;;  %p183_p10 = scmp.lt.s32.totalorder %s177_s2, %s177_s2 }
  0x17   :  { %143 = vmatmul.mubr.msk.f32.vlgmr.msra.gmra.mrb[0].mxu0 %vm35_vm1, %v27_v4 }
  0x18   :  { %p184_p11 = por %p183_p10, %p182_p9 }
  0x1a   :  { %p185_p12 = pnand %p184_p11, %p178_p8 }
  0x94   :  { %v33_v5 = vpop.permute.xlu0 %32 }
  0xea   :  { %v108_v6 = vpop.f32.mrb[0].mxu0 }
  0xeb   :  { %v109_v7 = vadd.f32 %v108_v6, %v33_v5  ;;  %v144_v8 = vpop.f32.mrb[1].mxu0 }
  0xed   :  { %v137_v9 = vmul.f32 -1.442695, %v109_v7 }
  0xef   :  { %151 = vpow2.f32 %v137_v9 }
  0xf9   :  { %v152_v10 = vpop.eup %151 }
  0xfa   :  { %v115_v11 = vadd.f32 1.0, %v152_v10 }
  0xfc   :  { %153 = vrcp.f32 %v115_v11 }
 0x106   :  { %v154_v12 = vpop.eup %153 }
 0x107   :  { %119 = vst.msk [vmem:[#allocation5] sm:$0xf] %vm118_vm2, %v154_v12 }
 0x108   :  { %188 = shalt.err (!%p185_p12)
}
 0x109   :  { %s189_s30 = scalar_lea.hbm %s261_s3, 64 }
 0x10a   :  { %p190_p13 = scmp.ne.s32.totalorder %s261_s3, %s189_s30  ;;  %p193_p0 = scmp.lt.u32.totalorder %s189_s30, %s261_s3 }
 0x10c   :  { %p195_p1 = pnand %p193_p0, %p190_p13 }
 0x10e   :  { %198 = shalt.err (!%p195_p1)
}
 0x10f   :  { %129 = dma.vmem_to_hbm [thread:$0]  %s127_s28, 64, %s261_s3, [#allocation4]  }
 0x110   :  { %201 = dma.done.wait [#allocation4], 64  }
 0x111   :  { %202 = vsyncadd [#allocation4], 4294967232 }
 0x112   :  { %133 = vsyncpa [#allocation3], 1 }
 0x113   :  { %134 = vsyncpa [#allocation4], 1 }

</bundles_post_ra>
